<compile_context>
chip_gen: v5e
topology: v5e:2x2
jax: 0.10.0
libtpu: 0.0.40
codegen_flags: <defaults>
</compile_context>

<pallas_src>
import functools

import jax
import jax.numpy as jnp
from jax.experimental import pallas as pl
from jax.experimental.pallas import tpu as pltpu


def _round_up(x, m):
    return ((x + m - 1) // m) * m


def _actor_kernel(state_ref, w1_ref, b1_ref, w2_ref, b2_ref, w3_ref, b3_ref,
                  out_ref, *, action_dim):
    x = state_ref[...]

    # Layer 1: Linear(state_dim -> hidden) + ReLU (f32 accumulation).
    h1 = jnp.dot(x, w1_ref[...], preferred_element_type=jnp.float32) + b1_ref[...]
    h1 = jnp.maximum(h1, 0.0)

    # Layer 2: Linear(hidden -> hidden) + ReLU.
    h2 = jnp.dot(h1.astype(w2_ref.dtype), w2_ref[...],
                 preferred_element_type=jnp.float32) + b2_ref[...]
    h2 = jnp.maximum(h2, 0.0)

    # Layer 3: Linear(hidden -> 2*action_dim, lane-padded to 128 columns).
    out = jnp.dot(h2.astype(w3_ref.dtype), w3_ref[...],
                  preferred_element_type=jnp.float32) + b3_ref[...]

    # Clamp only the log_std lanes (>= action_dim); padded lanes are exact
    # zeros (zero weight/bias columns) and get sliced off in the wrapper, so
    # clamping them too is harmless.  Single fused, lane-dense store.
    lane = jax.lax.broadcasted_iota(jnp.int32, out.shape, dimension=1)
    out = jnp.where(lane >= action_dim, jnp.clip(out, -20.0, 2.0), out)

    out_ref[...] = out.astype(out_ref.dtype)


def simple_actor_forward(state, params, *, tb=2048, use_bf16=False):
    """Pallas implementation of SimpleActor.forward.

    state:  [B, state_dim] float32
    params: dict with w1 [S,H], b1 [1,H], w2 [H,H], b2 [1,H],
            w3 [H,2A], b3 [1,2A]
    returns: (mean [B, A], log_std [B, A]) with log_std clamped to [-20, 2].
    """
    B, S = state.shape
    H = params["w1"].shape[1]
    out_dim = params["w3"].shape[1]
    action_dim = out_dim // 2

    # Lane-dense output: pad the final layer's output columns up to a multiple
    # of 128 lanes (zero columns on w3/b3 only -- a few KB, never `state`).
    out_pad = _round_up(out_dim, 128)
    w3, b3 = params["w3"], params["b3"]
    if out_pad != out_dim:
        w3 = jnp.pad(w3, ((0, 0), (0, out_pad - out_dim)))
        b3 = jnp.pad(b3, ((0, 0), (0, out_pad - out_dim)))

    # MXU operand dtype; biases / activations tail stay f32.
    mxu_dtype = jnp.bfloat16 if use_bf16 else jnp.float32
    state_in = state.astype(mxu_dtype)
    w1 = params["w1"].astype(mxu_dtype)
    w2 = params["w2"].astype(mxu_dtype)
    w3 = w3.astype(mxu_dtype)
    b1 = params["b1"].astype(jnp.float32)
    b2 = params["b2"].astype(jnp.float32)
    b3 = b3.astype(jnp.float32)

    # Batch tile selection.  No wrapper-side padding: a ragged trailing block
    # is handled by Pallas (OOB output rows are dropped; rows are independent).
    # When tb < B the tile must be a sublane multiple (8 f32 / 16 bf16); when
    # tb >= B a full-array block is always legal.  If the whole batch would be
    # one tile but is big enough for two legal tiles, split into 2 grid steps
    # so both TensorCores get work on v7x (harmless on 1-TC chips).
    sub = 16 if use_bf16 else 8
    tb = min(tb, B)
    if tb == B and B >= 2 * sub:
        tb = _round_up(pl.cdiv(B, 2), sub)
    elif tb < B:
        tb = _round_up(tb, sub)
    n_blocks = pl.cdiv(B, tb)

    def resident(a):
        zero = (0,) * a.ndim
        return pl.BlockSpec(a.shape, lambda i: zero)

    dsize = 2 if use_bf16 else 4
    flops = 2 * B * (S * H + H * H + H * out_pad)
    bytes_accessed = (
        dsize * (B * S + S * H + H * H + H * out_pad)   # state + weights
        + 4 * (2 * H + out_pad)                         # biases
        + 4 * B * out_pad                               # output slab
    )

    out = pl.pallas_call(
        functools.partial(_actor_kernel, action_dim=action_dim),
        out_shape=jax.ShapeDtypeStruct((B, out_pad), jnp.float32),
        grid=(n_blocks,),
        in_specs=[
            pl.BlockSpec((tb, S), lambda i: (i, 0)),
            resident(w1), resident(b1),
            resident(w2), resident(b2),
            resident(w3), resident(b3),
        ],
        out_specs=pl.BlockSpec((tb, out_pad), lambda i: (i, 0)),
        compiler_params=pltpu.CompilerParams(
            dimension_semantics=("parallel",)),
        cost_estimate=pl.CostEstimate(
            flops=flops, transcendentals=0, bytes_accessed=bytes_accessed),
    )(state_in, w1, b1, w2, b2, w3, b3)

    mean = out[:, :action_dim]
    log_std = out[:, action_dim:out_dim]
    return mean, log_std


def init_params(key, state_dim, action_dim, hidden_dim):
    """Deterministic init mimicking nn.Linear (uniform +/- 1/sqrt(fan_in))."""
    def linear(key, fan_in, fan_out):
        kw, kb = jax.random.split(key)
        bound = 1.0 / jnp.sqrt(fan_in)
        w = jax.random.uniform(kw, (fan_in, fan_out), jnp.float32, -bound, bound)
        b = jax.random.uniform(kb, (1, fan_out), jnp.float32, -bound, bound)
        return w, b

    k1, k2, k3 = jax.random.split(key, 3)
    w1, b1 = linear(k1, state_dim, hidden_dim)
    w2, b2 = linear(k2, hidden_dim, hidden_dim)
    w3, b3 = linear(k3, hidden_dim, action_dim * 2)
    return {"w1": w1, "b1": b1, "w2": w2, "b2": b2, "w3": w3, "b3": b3}


def _reference_forward(state, params):
    h1 = jnp.maximum(state @ params["w1"] + params["b1"], 0.0)
    h2 = jnp.maximum(h1 @ params["w2"] + params["b2"], 0.0)
    out = h2 @ params["w3"] + params["b3"]
    a = params["w3"].shape[1] // 2
    return out[:, :a], jnp.clip(out[:, a:], -20.0, 2.0)


if __name__ == "__main__":
    B, STATE_DIM, ACTION_DIM, HIDDEN_DIM = 2, 16, 4, 32

    key = jax.random.PRNGKey(0)
    k_state, k_params = jax.random.split(key)

    state = jax.random.normal(k_state, (B, STATE_DIM), jnp.float32)
    params = init_params(k_params, STATE_DIM, ACTION_DIM, HIDDEN_DIM)

    # Tiny batch (single full-array block).
    fwd = jax.jit(simple_actor_forward)
    mean, log_std = fwd(state, params)
    jax.block_until_ready((mean, log_std))

    mean_ref, log_std_ref = _reference_forward(state, params)
    assert mean.shape == (B, ACTION_DIM) and log_std.shape == (B, ACTION_DIM)
    assert jnp.allclose(mean, mean_ref, atol=1e-5, rtol=1e-5)
    assert jnp.allclose(log_std, log_std_ref, atol=1e-5, rtol=1e-5)

    # Batch-tiled path with a ragged trailing block (no wrapper padding) and
    # >= 2 grid steps on the "parallel" batch axis.
    B2 = 1000
    state2 = jax.random.normal(jax.random.PRNGKey(1), (B2, STATE_DIM), jnp.float32)
    mean2, log_std2 = jax.jit(simple_actor_forward)(state2, params)
    jax.block_until_ready((mean2, log_std2))
    mean2_ref, log_std2_ref = _reference_forward(state2, params)
    assert mean2.shape == (B2, ACTION_DIM) and log_std2.shape == (B2, ACTION_DIM)
    assert jnp.allclose(mean2, mean2_ref, atol=1e-5, rtol=1e-5)
    assert jnp.allclose(log_std2, log_std2_ref, atol=1e-5, rtol=1e-5)

    # Optional bf16 MXU path (v6e/v7x): halves HBM traffic on the dominant
    # state read; checked against the f32 reference with loose tolerance.
    mean3, log_std3 = jax.jit(
        functools.partial(simple_actor_forward, use_bf16=True))(state2, params)
    jax.block_until_ready((mean3, log_std3))
    assert jnp.allclose(mean3, mean2_ref, atol=1e-1, rtol=5e-2)
    assert jnp.allclose(log_std3, log_std2_ref, atol=1e-1, rtol=5e-2)

    # TODO(synk): SimpleActor.sample (Normal rsample + tanh squash log-prob) is
    # a separate stochastic method; only forward() is implemented here.

    print("KERNEL_OK")
</pallas_src>

<mosaic_0001>
module attributes {stable_mosaic.version = 11 : i64} {
  func.func @_actor_kernel(%arg0: i32, %arg1: memref<2x16xf32, #tpu.memory_space<vmem>>, %arg2: memref<16x32xf32, #tpu.memory_space<vmem>>, %arg3: memref<1x32xf32, #tpu.memory_space<vmem>>, %arg4: memref<32x32xf32, #tpu.memory_space<vmem>>, %arg5: memref<1x32xf32, #tpu.memory_space<vmem>>, %arg6: memref<32x128xf32, #tpu.memory_space<vmem>>, %arg7: memref<1x128xf32, #tpu.memory_space<vmem>>, %arg8: memref<2x128xf32, #tpu.memory_space<vmem>>) attributes {dimension_semantics = [#tpu.dimension_semantics<parallel>], iteration_bounds = array<i64: 1>, scalar_prefetch = 0 : i64, scratch_operands = 0 : i64, tpu.core_type = #tpu.core_type<tc>, window_params = [{transform_indices = @transform_0, window_bounds = array<i64: 2, 16>}, {pipeline_mode = #tpu.pipeline_mode<synchronous>, transform_indices = @transform_1, window_bounds = array<i64: 16, 32>}, {pipeline_mode = #tpu.pipeline_mode<synchronous>, transform_indices = @transform_2, window_bounds = array<i64: 1, 32>}, {pipeline_mode = #tpu.pipeline_mode<synchronous>, transform_indices = @transform_3, window_bounds = array<i64: 32, 32>}, {pipeline_mode = #tpu.pipeline_mode<synchronous>, transform_indices = @transform_4, window_bounds = array<i64: 1, 32>}, {pipeline_mode = #tpu.pipeline_mode<synchronous>, transform_indices = @transform_5, window_bounds = array<i64: 32, 128>}, {pipeline_mode = #tpu.pipeline_mode<synchronous>, transform_indices = @transform_6, window_bounds = array<i64: 1, 128>}, {transform_indices = @transform_7, window_bounds = array<i64: 2, 128>}]} {
    %c0 = arith.constant 0 : index
    %c0_0 = arith.constant 0 : index
    %0 = vector.load %arg1[%c0, %c0_0] : memref<2x16xf32, #tpu.memory_space<vmem>>, vector<2x16xf32>
    %c0_1 = arith.constant 0 : index
    %c0_2 = arith.constant 0 : index
    %1 = vector.load %arg2[%c0_1, %c0_2] : memref<16x32xf32, #tpu.memory_space<vmem>>, vector<16x32xf32>
    %cst = arith.constant dense<0.000000e+00> : vector<2x32xf32>
    %2 = tpu.matmul %0, %1, %cst {dimension_numbers = #tpu.dot_dimension_numbers<[1], [0], [0], [1], [0, 0, 1, 1], [], []>} : vector<2x16xf32>, vector<16x32xf32>, vector<2x32xf32> -> vector<2x32xf32>
    %c0_3 = arith.constant 0 : index
    %c0_4 = arith.constant 0 : index
    %3 = vector.load %arg3[%c0_3, %c0_4] : memref<1x32xf32, #tpu.memory_space<vmem>>, vector<1x32xf32>
    %4 = vector.broadcast %3 : vector<1x32xf32> to vector<2x32xf32>
    %5 = arith.addf %2, %4 : vector<2x32xf32>
    %cst_5 = arith.constant 0.000000e+00 : f32
    %6 = vector.broadcast %cst_5 : f32 to vector<2x32xf32>
    %7 = arith.maximumf %5, %6 : vector<2x32xf32>
    %c0_6 = arith.constant 0 : index
    %c0_7 = arith.constant 0 : index
    %8 = vector.load %arg4[%c0_6, %c0_7] : memref<32x32xf32, #tpu.memory_space<vmem>>, vector<32x32xf32>
    %cst_8 = arith.constant dense<0.000000e+00> : vector<2x32xf32>
    %9 = tpu.matmul %7, %8, %cst_8 {dimension_numbers = #tpu.dot_dimension_numbers<[1], [0], [0], [1], [0, 0, 1, 1], [], []>} : vector<2x32xf32>, vector<32x32xf32>, vector<2x32xf32> -> vector<2x32xf32>
    %c0_9 = arith.constant 0 : index
    %c0_10 = arith.constant 0 : index
    %10 = vector.load %arg5[%c0_9, %c0_10] : memref<1x32xf32, #tpu.memory_space<vmem>>, vector<1x32xf32>
    %11 = vector.broadcast %10 : vector<1x32xf32> to vector<2x32xf32>
    %12 = arith.addf %9, %11 : vector<2x32xf32>
    %cst_11 = arith.constant 0.000000e+00 : f32
    %13 = vector.broadcast %cst_11 : f32 to vector<2x32xf32>
    %14 = arith.maximumf %12, %13 : vector<2x32xf32>
    %c0_12 = arith.constant 0 : index
    %c0_13 = arith.constant 0 : index
    %15 = vector.load %arg6[%c0_12, %c0_13] : memref<32x128xf32, #tpu.memory_space<vmem>>, vector<32x128xf32>
    %cst_14 = arith.constant dense<0.000000e+00> : vector<2x128xf32>
    %16 = tpu.matmul %14, %15, %cst_14 {dimension_numbers = #tpu.dot_dimension_numbers<[1], [0], [0], [1], [0, 0, 1, 1], [], []>} : vector<2x32xf32>, vector<32x128xf32>, vector<2x128xf32> -> vector<2x128xf32>
    %c0_15 = arith.constant 0 : index
    %c0_16 = arith.constant 0 : index
    %17 = vector.load %arg7[%c0_15, %c0_16] : memref<1x128xf32, #tpu.memory_space<vmem>>, vector<1x128xf32>
    %18 = vector.broadcast %17 : vector<1x128xf32> to vector<2x128xf32>
    %19 = arith.addf %16, %18 : vector<2x128xf32>
    %20 = tpu.iota {dimensions = array<i32: 1>} : vector<2x128xi32>
    %c4_i32 = arith.constant 4 : i32
    %21 = vector.broadcast %c4_i32 : i32 to vector<2x128xi32>
    %22 = arith.cmpi sge, %20, %21 : vector<2x128xi32>
    %cst_17 = arith.constant -2.000000e+01 : f32
    %cst_18 = arith.constant 2.000000e+00 : f32
    %23 = vector.broadcast %cst_17 : f32 to vector<2x128xf32>
    %24 = arith.maximumf %23, %19 : vector<2x128xf32>
    %25 = vector.broadcast %cst_18 : f32 to vector<2x128xf32>
    %26 = arith.minimumf %25, %24 : vector<2x128xf32>
    %27 = arith.select %22, %26, %19 : vector<2x128xi1>, vector<2x128xf32>
    %c0_19 = arith.constant 0 : index
    %c0_20 = arith.constant 0 : index
    %28 = vector.load %arg8[%c0_19, %c0_20] : memref<2x128xf32, #tpu.memory_space<vmem>>, vector<2x128xf32>
    tpu.vector_store %arg8[%c0_19, %c0_20], %27 {strides = array<i32>} : memref<2x128xf32, #tpu.memory_space<vmem>>, vector<2x128xf32>,
    return
  }
  func.func @transform_0(%arg0: i32) -> (i32, i32) {
    %c0_i32 = arith.constant 0 : i32
    %c0_i32_0 = arith.constant 0 : i32
    return %arg0, %c0_i32 : i32, i32
  }
  func.func @transform_1(%arg0: i32) -> (i32, i32) {
    %c0_i32 = arith.constant 0 : i32
    %c0_i32_0 = arith.constant 0 : i32
    %c0_i32_1 = arith.constant 0 : i32
    return %c0_i32, %c0_i32_0 : i32, i32
  }
  func.func @transform_2(%arg0: i32) -> (i32, i32) {
    %c0_i32 = arith.constant 0 : i32
    %c0_i32_0 = arith.constant 0 : i32
    %c0_i32_1 = arith.constant 0 : i32
    return %c0_i32, %c0_i32_0 : i32, i32
  }
  func.func @transform_3(%arg0: i32) -> (i32, i32) {
    %c0_i32 = arith.constant 0 : i32
    %c0_i32_0 = arith.constant 0 : i32
    %c0_i32_1 = arith.constant 0 : i32
    return %c0_i32, %c0_i32_0 : i32, i32
  }
  func.func @transform_4(%arg0: i32) -> (i32, i32) {
    %c0_i32 = arith.constant 0 : i32
    %c0_i32_0 = arith.constant 0 : i32
    %c0_i32_1 = arith.constant 0 : i32
    return %c0_i32, %c0_i32_0 : i32, i32
  }
  func.func @transform_5(%arg0: i32) -> (i32, i32) {
    %c0_i32 = arith.constant 0 : i32
    %c0_i32_0 = arith.constant 0 : i32
    %c0_i32_1 = arith.constant 0 : i32
    return %c0_i32, %c0_i32_0 : i32, i32
  }
  func.func @transform_6(%arg0: i32) -> (i32, i32) {
    %c0_i32 = arith.constant 0 : i32
    %c0_i32_0 = arith.constant 0 : i32
    %c0_i32_1 = arith.constant 0 : i32
    return %c0_i32, %c0_i32_0 : i32, i32
  }
  func.func @transform_7(%arg0: i32) -> (i32, i32) {
    %c0_i32 = arith.constant 0 : i32
    %c0_i32_0 = arith.constant 0 : i32
    return %arg0, %c0_i32 : i32, i32
  }
}

</mosaic_0001>

<bundles_post_ra>
// kernel: simple_actor_forward.1
= control target key start
LH: loop header
LB: loop body
LE: loop exit
PB: predicated region body
PF: predicated region fallthrough
CT: control target
= control target key end

     0   :  { %vm33_vm0 = vcmask 130048   ;;  %vm66_vm1 = vcmask 261120   ;;  %v122_v19 = vlaneseq  ;;  %s224_s1 = inlined_call_operand.vmem [shape: f32[16,32], index: 1, kind: input, shape index: {}]   ;;  %s225_s0 = inlined_call_operand.vmem [shape: f32[2,16], index: 0, kind: input, shape index: {}]   ;;  %s226_s3 = inlined_call_operand.vmem [shape: f32[32,32], index: 3, kind: input, shape index: {}]   ;;  %s227_s2 = inlined_call_operand.vmem [shape: f32[1,32], index: 2, kind: input, shape index: {}]   ;;  %s228_s4 = inlined_call_operand.vmem [shape: f32[1,32], index: 4, kind: input, shape index: {}]   ;;  %s229_s5 = inlined_call_operand.vmem [shape: f32[32,128], index: 5, kind: input, shape index: {}]   ;;  %s230_s6 = inlined_call_operand.vmem [shape: f32[1,128], index: 6, kind: input, shape index: {}]   ;;  %s231_s7 = inlined_call_operand.vmem [shape: f32[2,128], index: 7, kind: output, shape index: {}]  }
   0x1   :  { %v28_v0 = vld [vmem:[%s224_s1 + $0x8] sm:$0xff]  ;;  %v27_v1 = vld [vmem:[%s224_s1] sm:$0xff]  ;;  %v61_v3 = vld [vmem:[%s226_s3 + $0x18] sm:$0xff] }
   0x2   :  { %51 = vmatpush.msra.mxu0 %v28_v0  ;;  %v26_v2 = vld [vmem:[%s225_s0] sm:$0x3]  ;;  %82 = vmatpush.msra.mxu1 %v61_v3  ;;  %v60_v4 = vld [vmem:[%s226_s3 + $0x10] sm:$0xff]  ;;  %v59_v5 = vld [vmem:[%s226_s3 + $0x8] sm:$0xff]  ;;  %v123_v22 = vand.u32 127, %v122_v19 }
   0x3   :  { %v58_v6 = vld [vmem:[%s226_s3] sm:$0xff]  ;;  %v94_v7 = vld [vmem:[%s229_s5 + $0x18] sm:$0xff]  ;;  %v93_v12 = vld [vmem:[%s229_s5 + $0x10] sm:$0xff] }
   0x4   :  { %52 = vmatpush.msra.mxu0 %v27_v1  ;;  %83 = vmatpush.msra.mxu1 %v60_v4  ;;  %v136_v8 = vld [vmem:[%s227_s2] ss:$0 sm:$0xff]  ;;  %v92_v13 = vld [vmem:[%s229_s5 + $0x8] sm:$0xff]  ;;  %vm124_vm2 = vcmp.ge.s32.totalorder %v123_v22, 4 }
   0x5   :  { %133 = vmatmul.msk.f32.vlgmr.msra.gmra.mxu0 %vm33_vm0, %v26_v2  ;;  %114 = vmatpush.msra.mxu2 %v94_v7  ;;  %v91_v14 = vld [vmem:[%s229_s5] sm:$0xff] }
   0x6   :  { %84 = vmatpush.msra.mxu1 %v59_v5  ;;  %v137_v15 = vld [vmem:[%s228_s4] ss:$0 sm:$0xff] }
   0x7   :  { %115 = vmatpush.msra.mxu2 %v93_v12  ;;  %v138_v20 = vld [vmem:[%s230_s6] ss:$0 sm:$0xff] }
   0x8   :  { %85 = vmatpush.msra.mxu1 %v58_v6 }
   0x9   :  { %116 = vmatpush.msra.mxu2 %v92_v13 }
   0xb   :  { %117 = vmatpush.msra.mxu2 %v91_v14 }
  0x82   :  { %v54_v9 = vpop.f32.mrf.mxu0 }
  0x83   :  { %v55_v10 = vadd.f32 %v136_v8, %v54_v9 }
  0x85   :  { %v57_v11 = vmax.f32 %v55_v10, 0.0 }
  0x87   :  { %134 = vmatmul.msk.f32.vlgmr.msra.gmra.mxu1 %vm66_vm1, %v57_v11 }
 0x104   :  { %v87_v16 = vpop.f32.mrf.mxu1 }
 0x105   :  { %v88_v17 = vadd.f32 %v137_v15, %v87_v16 }
 0x107   :  { %v90_v18 = vmax.f32 %v88_v17, 0.0 }
 0x109   :  { %135 = vmatmul.msk.f32.vlgmr.msra.gmra.mxu2 %vm66_vm1, %v90_v18 }
 0x18c   :  { %v119_v21 = vpop.f32.mrf.mxu2 }
 0x18d   :  { %v120_v23 = vadd.f32 %v138_v20, %v119_v21 }
 0x18f   :  { %v125_v24 = vmax.f32 %v120_v23, -20.0 }
 0x191   :  { %v126_v25 = vmin.f32 %v125_v24, 2.0 }
 0x193   :  { %v127_v26 = vsel %vm124_vm2, %v126_v25, %v120_v23 }
 0x194   :  { %128 = vst [vmem:[%s231_s7] sm:$0x3] %v127_v26 }

</bundles_post_ra>
